<compile_context>
chip_gen: v5e
topology: v5e:2x2
jax: 0.10.0
libtpu: 0.0.40
codegen_flags: <defaults>
</compile_context>

<pallas_src>
import functools

import jax
import jax.numpy as jnp
from jax.experimental import pallas as pl
from jax.experimental.pallas import tpu as pltpu


def _mean_fc_kernel(h_ref, w_ref, b_ref, o_ref, acc_ref, *, T, tT, needs_mask):
    t = pl.program_id(0)

    @pl.when(t == 0)
    def _():
        acc_ref[...] = jnp.zeros_like(acc_ref)

    h = h_ref[...]                                    # (B, tT, H), native dtype
    if needs_mask:
        # Last block may overrun T; zero out the invalid (padded) time rows.
        row = jax.lax.broadcasted_iota(jnp.int32, h.shape, 1) + t * tT
        h = jnp.where(row < T, h, jnp.zeros_like(h))

    # Per-tile time-sum, accumulated in f32 scratch (precision-safe for long T).
    acc_ref[...] += jnp.sum(h, axis=1, dtype=jnp.float32)          # (B, H)

    @pl.when(t == pl.num_programs(0) - 1)
    def _():
        mean = acc_ref[...] * jnp.float32(1.0 / T)                 # (B, H)
        logits = jnp.dot(mean, w_ref[...].astype(jnp.float32),
                         preferred_element_type=jnp.float32)       # (B, Cpad)
        o_ref[...] = (logits + b_ref[...].astype(jnp.float32)).astype(o_ref.dtype)


def mert_classifier_head(hidden_states, fc_weight, fc_bias, *, time_tile=None):
    """hidden_states: (B, T, H); fc_weight: (H, C); fc_bias: (C,) -> logits (B, C)."""
    B, T, H = hidden_states.shape
    C = fc_weight.shape[1]
    itemsize = jnp.dtype(hidden_states.dtype).itemsize

    # Pad the class dim up to a lane-dense multiple of 128 (unmasked vst).
    C_pad = max(128, ((C + 127) // 128) * 128)
    w_pad = jnp.zeros((H, C_pad), fc_weight.dtype).at[:, :C].set(fc_weight)
    b_pad = jnp.zeros((1, C_pad), fc_bias.dtype).at[0, :C].set(fc_bias)

    # Pick the time tile: a ~24 MiB double-buffered input budget keeps the
    # pipeline safe on v7x's 64 MiB VMEM while still being large enough to hit
    # HBM roofline on v5e/v6e. The block's second-to-last dim must be a
    # multiple of 8 (or equal to the full T).
    if time_tile is None:
        budget = 24 * 1024 * 1024
        max_rows = max(1, budget // (2 * B * H * itemsize))
        time_tile = T if max_rows >= T else max(8, (max_rows // 8) * 8)
    tT = min(int(time_tile), T)
    if tT != T and tT % 8 != 0:
        tT = max(8, (tT // 8) * 8)
    if T <= 8:
        tT = T

    num_t = pl.cdiv(T, tT)
    needs_mask = (T % tT) != 0

    # Scoped VMEM: double-buffered input tile + resident weights/bias/output/acc.
    tile_bytes = 2 * B * tT * H * itemsize
    fixed_bytes = (H * C_pad + C_pad + 2 * B * C_pad + B * H) * 4
    vmem_limit = int(min(56 * 1024 * 1024,
                         max(16 * 1024 * 1024, (tile_bytes + fixed_bytes) * 3 // 2)))

    kernel = functools.partial(_mean_fc_kernel, T=T, tT=tT, needs_mask=needs_mask)

    logits_pad = pl.pallas_call(
        kernel,
        out_shape=jax.ShapeDtypeStruct((B, C_pad), jnp.float32),
        grid_spec=pltpu.PrefetchScalarGridSpec(
            num_scalar_prefetch=0,
            grid=(num_t,),
            in_specs=[
                # Streaming input: tile over the time (reduction) axis.
                pl.BlockSpec((B, tT, H), lambda t: (0, t, 0)),
                # Weights / bias: constant index_map -> stay resident in VMEM.
                pl.BlockSpec((H, C_pad), lambda t: (0, 0)),
                pl.BlockSpec((1, C_pad), lambda t: (0, 0)),
            ],
            out_specs=pl.BlockSpec((B, C_pad), lambda t: (0, 0)),
            scratch_shapes=[pltpu.VMEM((B, H), jnp.float32)],
        ),
        # Single reduction axis -> "arbitrary". (A batch grid axis marked
        # "parallel" could be added for v7x megacore if B were large and tiled.)
        compiler_params=pltpu.CompilerParams(
            dimension_semantics=("arbitrary",),
            vmem_limit_bytes=vmem_limit,
        ),
    )(hidden_states, w_pad, b_pad)

    return logits_pad[:, :C]


if __name__ == "__main__":
    # Small deterministic stand-in shapes (B, T, H) consistent with the module's
    # 'first' hidden_states branch. T=20 with time_tile=8 exercises multi-step
    # accumulation and the partial-last-block masking path.
    B, T, H = 2, 20, 32
    num_classes = 4

    key = jax.random.PRNGKey(0)
    k_h, k_w, k_b = jax.random.split(key, 3)

    hidden_states = jax.random.normal(k_h, (B, T, H), dtype=jnp.float32)

    # Deterministic init of the fc head (nn.Linear(H, num_classes)).
    fc_weight = jax.random.normal(k_w, (H, num_classes), dtype=jnp.float32) * 0.02
    fc_bias = jax.random.normal(k_b, (num_classes,), dtype=jnp.float32) * 0.02

    logits = mert_classifier_head(hidden_states, fc_weight, fc_bias, time_tile=8)
    logits = jax.block_until_ready(logits)

    # Reference (same semantics as the PyTorch forward).
    ref = jnp.mean(hidden_states, axis=1) @ fc_weight + fc_bias
    assert logits.shape == (B, num_classes)
    assert jnp.allclose(logits, ref, atol=1e-5, rtol=1e-5)

    print("KERNEL_OK")
</pallas_src>

<mosaic_0001>
module attributes {stable_mosaic.version = 11 : i64} {
  func.func @_mean_fc_kernel(%arg0: i32, %arg1: memref<2x8x32xf32, #tpu.memory_space<vmem>>, %arg2: memref<32x128xf32, #tpu.memory_space<vmem>>, %arg3: memref<1x128xf32, #tpu.memory_space<vmem>>, %arg4: memref<2x128xf32, #tpu.memory_space<vmem>>, %arg5: memref<2x32xf32, #tpu.memory_space<vmem>>) attributes {dimension_semantics = [#tpu.dimension_semantics<arbitrary>], iteration_bounds = array<i64: 3>, scalar_prefetch = 0 : i64, scratch_operands = 1 : i64, tpu.core_type = #tpu.core_type<tc>, window_params = [{transform_indices = @transform_0, window_bounds = array<i64: 2, 8, 32>}, {pipeline_mode = #tpu.pipeline_mode<synchronous>, transform_indices = @transform_1, window_bounds = array<i64: 32, 128>}, {pipeline_mode = #tpu.pipeline_mode<synchronous>, transform_indices = @transform_2, window_bounds = array<i64: 1, 128>}, {pipeline_mode = #tpu.pipeline_mode<synchronous>, transform_indices = @transform_3, window_bounds = array<i64: 2, 128>}]} {
    %c0_i32 = arith.constant 0 : i32
    %0 = arith.cmpi eq, %arg0, %c0_i32 : i32
    %1 = arith.extui %0 : i1 to i32
    %c0_i32_0 = arith.constant 0 : i32
    %2 = arith.cmpi ne, %1, %c0_i32_0 : i32
    scf.if %2 {
      %cst_9 = arith.constant 0.000000e+00 : f32
      %19 = vector.broadcast %cst_9 : f32 to vector<2x32xf32>
      %c0_10 = arith.constant 0 : index
      %c0_11 = arith.constant 0 : index
      %20 = vector.load %arg5[%c0_10, %c0_11] : memref<2x32xf32, #tpu.memory_space<vmem>>, vector<2x32xf32>
      tpu.vector_store %arg5[%c0_10, %c0_11], %19 {strides = array<i32>} : memref<2x32xf32, #tpu.memory_space<vmem>>, vector<2x32xf32>,
    } else {
    }
    %c0 = arith.constant 0 : index
    %c0_1 = arith.constant 0 : index
    %c0_2 = arith.constant 0 : index
    %3 = vector.load %arg1[%c0, %c0_1, %c0_2] : memref<2x8x32xf32, #tpu.memory_space<vmem>>, vector<2x8x32xf32>
    %4 = tpu.iota {dimensions = array<i32: 1>} : vector<2x8x32xi32>
    %c8_i32 = arith.constant 8 : i32
    %5 = arith.muli %arg0, %c8_i32 : i32
    %6 = vector.broadcast %5 : i32 to vector<2x8x32xi32>
    %7 = arith.addi %4, %6 : vector<2x8x32xi32>
    %c20_i32 = arith.constant 20 : i32
    %8 = vector.broadcast %c20_i32 : i32 to vector<2x8x32xi32>
    %9 = arith.cmpi slt, %7, %8 : vector<2x8x32xi32>
    %cst = arith.constant 0.000000e+00 : f32
    %10 = vector.broadcast %cst : f32 to vector<2x8x32xf32>
    %11 = arith.select %9, %3, %10 : vector<2x8x32xi1>, vector<2x8x32xf32>
    %c0_3 = arith.constant 0 : index
    %c0_4 = arith.constant 0 : index
    %12 = vector.load %arg5[%c0_3, %c0_4] : memref<2x32xf32, #tpu.memory_space<vmem>>, vector<2x32xf32>
    %cst_5 = arith.constant dense<0.000000e+00> : vector<2x32xf32>
    %13 = vector.multi_reduction <add>, %11, %cst_5 [1] : vector<2x8x32xf32> to vector<2x32xf32>
    %14 = arith.addf %12, %13 : vector<2x32xf32>
    %c0_6 = arith.constant 0 : index
    %c0_7 = arith.constant 0 : index
    %15 = vector.load %arg5[%c0_6, %c0_7] : memref<2x32xf32, #tpu.memory_space<vmem>>, vector<2x32xf32>
    tpu.vector_store %arg5[%c0_6, %c0_7], %14 {strides = array<i32>} : memref<2x32xf32, #tpu.memory_space<vmem>>, vector<2x32xf32>,
    %c2_i32 = arith.constant 2 : i32
    %16 = arith.cmpi eq, %arg0, %c2_i32 : i32
    %17 = arith.extui %16 : i1 to i32
    %c0_i32_8 = arith.constant 0 : i32
    %18 = arith.cmpi ne, %17, %c0_i32_8 : i32
    scf.if %18 {
      %c0_9 = arith.constant 0 : index
      %c0_10 = arith.constant 0 : index
      %19 = vector.load %arg5[%c0_9, %c0_10] : memref<2x32xf32, #tpu.memory_space<vmem>>, vector<2x32xf32>
      %cst_11 = arith.constant 5.000000e-02 : f32
      %20 = vector.broadcast %cst_11 : f32 to vector<2x32xf32>
      %21 = arith.mulf %19, %20 : vector<2x32xf32>
      %c0_12 = arith.constant 0 : index
      %c0_13 = arith.constant 0 : index
      %22 = vector.load %arg2[%c0_12, %c0_13] : memref<32x128xf32, #tpu.memory_space<vmem>>, vector<32x128xf32>
      %cst_14 = arith.constant dense<0.000000e+00> : vector<2x128xf32>
      %23 = tpu.matmul %21, %22, %cst_14 {dimension_numbers = #tpu.dot_dimension_numbers<[1], [0], [0], [1], [0, 0, 1, 1], [], []>} : vector<2x32xf32>, vector<32x128xf32>, vector<2x128xf32> -> vector<2x128xf32>
      %c0_15 = arith.constant 0 : index
      %c0_16 = arith.constant 0 : index
      %24 = vector.load %arg3[%c0_15, %c0_16] : memref<1x128xf32, #tpu.memory_space<vmem>>, vector<1x128xf32>
      %25 = vector.broadcast %24 : vector<1x128xf32> to vector<2x128xf32>
      %26 = arith.addf %23, %25 : vector<2x128xf32>
      %c0_17 = arith.constant 0 : index
      %c0_18 = arith.constant 0 : index
      %27 = vector.load %arg4[%c0_17, %c0_18] : memref<2x128xf32, #tpu.memory_space<vmem>>, vector<2x128xf32>
      tpu.vector_store %arg4[%c0_17, %c0_18], %26 {strides = array<i32>} : memref<2x128xf32, #tpu.memory_space<vmem>>, vector<2x128xf32>,
    } else {
    }
    return
  }
  func.func @transform_0(%arg0: i32) -> (i32, i32, i32) {
    %c0_i32 = arith.constant 0 : i32
    %c0_i32_0 = arith.constant 0 : i32
    %c0_i32_1 = arith.constant 0 : i32
    return %c0_i32, %arg0, %c0_i32_0 : i32, i32, i32
  }
  func.func @transform_1(%arg0: i32) -> (i32, i32) {
    %c0_i32 = arith.constant 0 : i32
    %c0_i32_0 = arith.constant 0 : i32
    %c0_i32_1 = arith.constant 0 : i32
    return %c0_i32, %c0_i32_0 : i32, i32
  }
  func.func @transform_2(%arg0: i32) -> (i32, i32) {
    %c0_i32 = arith.constant 0 : i32
    %c0_i32_0 = arith.constant 0 : i32
    %c0_i32_1 = arith.constant 0 : i32
    return %c0_i32, %c0_i32_0 : i32, i32
  }
  func.func @transform_3(%arg0: i32) -> (i32, i32) {
    %c0_i32 = arith.constant 0 : i32
    %c0_i32_0 = arith.constant 0 : i32
    %c0_i32_1 = arith.constant 0 : i32
    return %c0_i32, %c0_i32_0 : i32, i32
  }
}

</mosaic_0001>

<bundles_post_ra>
// kernel: tpu_custom_call.1
= control target key start
LH: loop header
LB: loop body
LE: loop exit
PB: predicated region body
PF: predicated region fallthrough
CT: control target
= control target key end

     0   :  { %8 = vsyncpa [#allocation5], 0  ;;  %s454_s12 = smov 0   ;;  %s456_s13 = smov 0   ;;  %s518_s0 = inlined_call_operand.vmem [shape: f32[2,20,32], index: 0, kind: input, shape index: {}]   ;;  %s519_s1 = inlined_call_operand.vmem [shape: f32[32,128], index: 1, kind: input, shape index: {}]   ;;  %s520_s2 = inlined_call_operand.vmem [shape: f32[1,128], index: 2, kind: input, shape index: {}]   ;;  %s521_s3 = inlined_call_operand.hbm [shape: f32[2,128], index: 3, kind: output, shape index: {}]  }
   0x1   :  { %s458_s14 = smov 0  }
   0x2 LB: > { %s467_s15 = sadd.s32 4294967295, %s430_s14   ;;  %s469_s16 = sadd.s32 1, %s430_s14   ;;  %s430_s14 = sphi %s458_s14, %s524_s14   ;;  %s426_s13 = sphi %s456_s13, %s523_s13   ;;  %s422_s12 = sphi %s454_s12, %s522_s12  }
   0x3   : > { %s18_s17 = ssub.s32 %s430_s14, %s469_s16  ;;  %s21_s18 = sadd.s32 1, %s426_s13 }
   0x4   : > { %p19_p0 = scmp.eq.s32.totalorder %s18_s17, 0  ;;  %p28_p1 = scmp.ne.s32.totalorder %s426_s13, %s422_s12 }
   0x5   : > { %p29_p2 = scmp.eq.s32.totalorder %s430_s14, 0  ;;  %p330_p4 = scmp.ge.s32.totalorder %s430_s14, 3 }
   0x6   : > { %s476_s19 = scalar_select %p19_p0, %s426_s13, %s21_s18  }
   0x7   : > { %p30_p3 = por %p29_p2, %p28_p1  ;;  %123 = sbr.rel (%p330_p4) target bundleno = 18 (0x12), region = 24 }
   0xc   : > { %126 = sbr.rel (!%p30_p3) target bundleno = 18 (0x12), region = 28  ;;  %s128_s20 = sand.u32 (%p30_p3), 1, %s426_s13  }
   0xd   : > { %s332_s21 = sshll.u32 (%p30_p3), %s430_s14, 3  ;;  %s331_s22 = sshll.u32 (%p30_p3), %s128_s20, 4 }
   0xe   : > { %s132_s25 = scalar_lea.vmem (%p30_p3), %s518_s0, %s332_s21  ;;  %s130_s26 = scalar_lea.vmem (%p30_p3), [#allocation3], %s331_s22 }
   0xf   : > { %v163_v0 = vld [vmem:[%s132_s25] sm:$0xff] (%p30_p3)  ;;  %v165_v1 = vld [vmem:[%s132_s25 + $0x18] sm:$0xff] (%p30_p3) }
  0x10   : > { %164 = vst [vmem:[%s130_s26] sm:$0xff] (%p30_p3), %v163_v0 }
  0x11   : > { %166 = vst [vmem:[%s130_s26 + $0x8] sm:$0xff] %v165_v1 }
  0x12 PF: > { %p333_p5 = scmp.ge.s32.totalorder %s430_s14, 1  ;;  %p171_p6 = scmp.lt.s32.totalorder %s430_s14, 4 }
  0x14   : > { %p172_p7 = pnand %p333_p5, %p171_p6 }
  0x15   : > { %s178_s27 = sand.u32 (!%p172_p7), 1, %s422_s12   ;;  %p335_p8 = scmp.ne.s32.totalorder (!%p172_p7), %s467_s15, 0 }
  0x16   : > { %175 = sbr.rel (%p172_p7) target bundleno = 202 (0xca), region = 66  ;;  %s334_s28 = sshll.u32 (!%p172_p7), %s178_s27, 4 }
  0x17   : > { %s180_s29 = scalar_lea.vmem (!%p172_p7), [#allocation3], %s334_s28 }
  0x1b   : > { %199 = sbr.rel (%p335_p8) target bundleno = 34 (0x22), region = 74 }
  0x20   : > { %vm200_vm0 = vcmask 254976   ;;  %v432_v2 = vmov 0.0  }
  0x21   : > { %201 = vst.msk [vmem:[#allocation2] sm:$0x3] %vm200_vm0, %v432_v2 }
  0x22 PF: > { %v204_v3 = vlaneseq  ;;  %s336_s30 = sshll.u32 %s467_s15, 3  ;;  %v202_v6 = vld [vmem:[%s180_s29] sm:$0xff]  ;;  %v203_v7 = vld [vmem:[%s180_s29 + $0x8] sm:$0xff]  ;;  %vm213_vm1 = vcmask 261120   ;;  %vm230_vm3 = vcmask 1041409   ;;  %vm234_vm4 = vcmask 254976  }
  0x23   : > { %v207_v4 = vstv %s336_s30  ;;  %p337_p9 = scmp.ne.s32.totalorder %s467_s15, 2 }
  0x24   : > { %v205_v5 = vshrl.u32 %v204_v3, 7 }
  0x26   : > { %v208_v8 = vadd.s32 %v207_v4, %v205_v5 }
  0x28   : > { %vm209_vm2 = vcmp.lt.s32.totalorder %v208_v8, 20  ;;  %v212_v23 = vld [vmem:[#allocation2] sm:$0x3] }
  0x29   : > { %v210_v9 = vsel %vm209_vm2, %v202_v6, 0.0  ;;  %v211_v10 = vsel %vm209_vm2, %v203_v7, 0.0 }
  0x2a   : > { %v214_v11 = vsel %vm213_vm1, %v210_v9, 0.0  ;;  %v221_v12 = vsel %vm213_vm1, %v211_v10, 0.0 }
  0x2b   : > { %v215_v13 = vrot.slane %v214_v11, 4  ;;  %v222_v14 = vrot.slane %v221_v12, 4 }
  0x2d   : > { %v216_v15 = vadd.f32 %v215_v13, %v214_v11  ;;  %v223_v16 = vadd.f32 %v222_v14, %v221_v12 }
  0x2f   : > { %v217_v17 = vrot.slane %v216_v15, 2  ;;  %v224_v18 = vrot.slane %v223_v16, 2 }
  0x31   : > { %v218_v19 = vadd.f32 %v217_v17, %v216_v15  ;;  %v225_v20 = vadd.f32 %v224_v18, %v223_v16 }
  0x33   : > { %v219_v21 = vrot.slane %v218_v19, 1  ;;  %v226_v22 = vrot.slane %v225_v20, 1 }
  0x35   : > { %v220_v24 = vadd.f32 %v219_v21, %v218_v19  ;;  %v227_v25 = vadd.f32 %v226_v22, %v225_v20 }
  0x36   : > { %239 = sbr.rel (%p337_p9) target bundleno = 197 (0xc5), region = 78 }
  0x37   : > { %v231_v26 = vsel %vm230_vm3, %v227_v25, %v220_v24 }
  0x38   : > { %v233_v27 = vadd.f32 %v231_v26, %v212_v23 }
  0x3a   : > { %235 = vst.msk [vmem:[#allocation2] sm:$0x3] %vm234_vm4, %v233_v27 }
  0x3b   : > { %v245_v28 = vld [vmem:[%s519_s1 + $0x18] sm:$0xff]  ;;  %v244_v29 = vld [vmem:[%s519_s1 + $0x10] sm:$0xff]  ;;  %v243_v31 = vld [vmem:[%s519_s1 + $0x8] sm:$0xff] }
  0x3c   : > { %265 = vmatpush.msra.mxu0 %v245_v28  ;;  %v242_v32 = vld [vmem:[%s519_s1] sm:$0xff] }
  0x3d   : > { %v375_v34 = vld [vmem:[%s520_s2] ss:$0 sm:$0xff] }
  0x3e   : > { %266 = vmatpush.msra.mxu0 %v244_v29 }
  0x40   : > { %267 = vmatpush.msra.mxu0 %v243_v31 }
  0x41   : > { %v240_v30 = vld [vmem:[#allocation2] sm:$0x3] }
  0x42   : > { %v241_v33 = vmul.f32 0.05, %v240_v30  ;;  %268 = vmatpush.msra.mxu0 %v242_v32 }
  0x44   : > { %338 = vmatmul.msk.f32.vlgmr.msra.gmra.mxu0 %vm213_vm1, %v241_v33 }
  0xc1   : > { %v270_v35 = vpop.f32.mrf.mxu0 }
  0xc2   : > { %v271_v36 = vadd.f32 %v375_v34, %v270_v35 }
  0xc4   : > { %273 = vst [vmem:[#allocation4] sm:$0x3] %v271_v36 }
  0xc5 PF: > { %p347_p10 = scmp.eq.s32.totalorder %s467_s15, 2  ;;  %s433_s17 = smov [#allocation4]  }
  0xc6   : > { %s280_s18 = sshll.u32 %s433_s17, 4  ;;  %s282_s22 = sshll.u32 %s521_s3, 4  ;;  %s281_s18 = int_to_ptr.vmem [resolvable:$true] %s280_s18  ;;  %s283_s22 = int_to_ptr.hbm [resolvable:$true] %s282_s22 }
  0xc7   : > { %344 = dma.vmem_to_hbm [thread:$0]  (%p347_p10), %s281_s18, 32, %s283_s22, [#allocation5]  }
  0xc8   : > { %417 = dma.done.wait (%p347_p10), [#allocation5], 32  }
  0xc9   : > { %419 = vsyncadd (%p347_p10), [#allocation5], 4294967264 }
  0xca PF: > { %p11_p11 = scmp.ge.s32.totalorder %s469_s16, 5   ;;  %s522_s12 = smov %s426_s13 }
  0xcb   : > { %s523_s13 = smov %s476_s19  ;;  %s524_s14 = smov %s469_s16 }
  0xcc   :  { %13 = sbr.rel (!%p11_p11) target bundleno = 2 (0x2), region = 110 }
  0xd1   :  { %296 = vsyncpa [#allocation5], 1 }
  0xd2   :  { %298 = vsyncpa [#allocation5 + $0x1], 1 }

</bundles_post_ra>
